<compile_context>
chip_gen: v7x
topology: tpu7x:2x2x1
jax: 0.10.0
libtpu: 0.0.40
codegen_flags: <defaults>
</compile_context>

<pallas_src>
import jax
import jax.numpy as jnp
from jax import lax
from jax.experimental import pallas as pl
from jax.experimental.pallas import tpu as pltpu


_LANES = 1024          # lane-dense last dim (multiple of 128)
_ROWS_PER_TILE = 256   # 256 x 1024 f32 = 1 MiB per input block per buffer


# ----------------------------------------------------------------------------
# CapsuleLoss kernel: streamed MSE + margin loss, single scalar out
# ----------------------------------------------------------------------------
def _make_capsule_kernel(upper, lower, lmda, recon_scale):
    def kernel(labels_ref, logits_ref, img_ref, rec_ref, out_ref, acc_ref):
        step = pl.program_id(0)

        @pl.when(step == 0)
        def _init():
            acc_ref[0] = jnp.float32(0.0)

        # Streamed, tiled sum-of-squares. Upcast per tile; accumulate in f32.
        diff = rec_ref[...].astype(jnp.float32) - img_ref[...].astype(jnp.float32)
        acc_ref[0] += jnp.sum(diff * diff)

        @pl.when(step == pl.num_programs(0) - 1)
        def _finalize():
            # Tiny (B, K) margin term: computed once, off the streamed path.
            logits = logits_ref[...].astype(jnp.float32)
            labels = labels_ref[...].astype(jnp.float32)
            left = jnp.maximum(upper - logits, 0.0) ** 2     # (upper - logits).relu()**2
            right = jnp.maximum(logits - lower, 0.0) ** 2    # (logits - lower).relu()**2
            margin = (jnp.sum(labels * left)
                      + lmda * jnp.sum((1.0 - labels) * right))
            out_ref[0, 0] = margin + recon_scale * acc_ref[0]

    return kernel


def capsule_loss(images, labels, logits, reconstructions,
                 upper=0.9, lower=0.1, lmda=0.5, recon_scale=0.0005,
                 lanes=_LANES, rows_per_tile=_ROWS_PER_TILE):
    """margin_loss + recon_scale * MSELoss(reduction='sum')(recon.view(images.shape), images)."""
    assert lanes % 128 == 0
    n = int(images.size)

    # Keep native dtype (bf16 stays bf16) -> half the HBM traffic vs host astype.
    img_flat = images.reshape(-1)
    rec_flat = reconstructions.reshape(-1)   # == .view(images.shape) then flatten

    rows = pl.cdiv(n, lanes)
    tr = rows_per_tile if rows >= rows_per_tile else rows
    rows_pad = pl.cdiv(rows, tr) * tr
    n_pad = rows_pad * lanes
    if n_pad != n:
        # Identical zero padding on both tensors -> padded lanes add 0 to MSE.
        img_flat = jnp.pad(img_flat, (0, n_pad - n))
        rec_flat = jnp.pad(rec_flat, (0, n_pad - n))
    img2d = img_flat.reshape(rows_pad, lanes)
    rec2d = rec_flat.reshape(rows_pad, lanes)

    grid = (rows_pad // tr,)

    out = pl.pallas_call(
        _make_capsule_kernel(float(upper), float(lower), float(lmda),
                             float(recon_scale)),
        out_shape=jax.ShapeDtypeStruct((1, 1), jnp.float32),
        grid=grid,
        in_specs=[
            pl.BlockSpec(labels.shape, lambda i: (0, 0)),   # resident, DMA'd once
            pl.BlockSpec(logits.shape, lambda i: (0, 0)),   # resident, DMA'd once
            pl.BlockSpec((tr, lanes), lambda i: (i, 0)),    # streamed
            pl.BlockSpec((tr, lanes), lambda i: (i, 0)),    # streamed
        ],
        out_specs=pl.BlockSpec(memory_space=pltpu.MemorySpace.SMEM),
        scratch_shapes=[pltpu.SMEM((1,), jnp.float32)],
        compiler_params=pltpu.CompilerParams(
            dimension_semantics=("arbitrary",),   # reduction axis with accumulator
            vmem_limit_bytes=32 * 1024 * 1024,
        ),
    )(labels, logits, img2d, rec2d)
    return out[0, 0]


# ----------------------------------------------------------------------------
# CrossEntropyLoss kernel (for model_flag 'res*', reconstruction is None)
# B x K is tiny for a classification head -> single block, upcast in-kernel.
# ----------------------------------------------------------------------------
def _ce_kernel(targets_ref, logits_ref, out_ref):
    logits = logits_ref[...].astype(jnp.float32)            # (B, K)
    tgt = targets_ref[...]                                   # (B, 1) int32
    b, k = logits.shape
    m = jnp.max(logits, axis=-1, keepdims=True)
    lse = jnp.log(jnp.sum(jnp.exp(logits - m), axis=-1, keepdims=True)) + m  # (B,1)
    cls = lax.broadcasted_iota(jnp.int32, (b, k), 1)
    onehot = (cls == tgt).astype(jnp.float32)
    picked = jnp.sum(logits * onehot, axis=-1, keepdims=True)                # (B,1)
    out_ref[0, 0] = jnp.sum(lse - picked) / jnp.float32(b)   # mean over batch


def cross_entropy_loss(logits, targets):
    tgt2d = targets.astype(jnp.int32).reshape(-1, 1)
    out = pl.pallas_call(
        _ce_kernel,
        out_shape=jax.ShapeDtypeStruct((1, 1), jnp.float32),
        in_specs=[
            pl.BlockSpec(tgt2d.shape, lambda: (0, 0)),
            pl.BlockSpec(logits.shape, lambda: (0, 0)),
        ],
        out_specs=pl.BlockSpec(memory_space=pltpu.MemorySpace.SMEM),
    )(tgt2d, logits)
    return out[0, 0]


# ----------------------------------------------------------------------------
# Criterion wrapper (mirrors the PyTorch module)
# ----------------------------------------------------------------------------
class Criterion:
    def __init__(self, model_flag):
        self.model_flag = model_flag
        if model_flag[:3] == 'res':
            self._mode = 'ce'
            self._recon_scale = None
        elif model_flag[:2] == 'bp':
            self._mode = 'caps'
            self._recon_scale = 0.5
        else:
            self._mode = 'caps'
            self._recon_scale = 0.0005

    def __call__(self, inputs, targets, outputs, reconstruction):
        if reconstruction is None:
            # PyTorch path: CrossEntropyLoss(outputs, targets)
            return cross_entropy_loss(outputs, targets)
        # PyTorch path: CapsuleLoss(inputs, targets, outputs, reconstruction)
        # NOTE: as in the original module, `targets` must already be one-hot here.
        return capsule_loss(inputs, targets, outputs, reconstruction,
                            upper=0.9, lower=0.1, lmda=0.5,
                            recon_scale=self._recon_scale)


# ----------------------------------------------------------------------------
# Pure-JAX references for verification
# ----------------------------------------------------------------------------
def _ref_capsule(images, labels, logits, recon, recon_scale):
    logits = logits.astype(jnp.float32)
    labels = labels.astype(jnp.float32)
    left = jnp.maximum(0.9 - logits, 0.0) ** 2
    right = jnp.maximum(logits - 0.1, 0.0) ** 2
    margin = jnp.sum(labels * left) + 0.5 * jnp.sum((1.0 - labels) * right)
    diff = (recon.reshape(images.shape).astype(jnp.float32)
            - images.astype(jnp.float32))
    return margin + recon_scale * jnp.sum(diff * diff)


def _ref_ce(logits, targets):
    logp = jax.nn.log_softmax(logits.astype(jnp.float32), axis=-1)
    return -jnp.mean(jnp.take_along_axis(logp, targets[:, None], axis=-1))


if __name__ == "__main__":
    key = jax.random.PRNGKey(0)
    k1, k2, k3, k4, k5, k6 = jax.random.split(key, 6)
    K = 10

    # --- case 1: default flag (CapsuleLoss, recon_scale=0.0005), tiny f32 ---
    B, C, H, W = 2, 1, 16, 16
    images = jax.random.uniform(k1, (B, C, H, W), dtype=jnp.float32)
    tgt_idx = jax.random.randint(k2, (B,), 0, K)
    labels = jax.nn.one_hot(tgt_idx, K, dtype=jnp.float32)
    logits = jax.random.uniform(k3, (B, K), dtype=jnp.float32)
    recon = jax.random.uniform(k4, (B, C * H * W), dtype=jnp.float32)

    crit = Criterion("caps")
    loss = jax.block_until_ready(crit(images, labels, logits, recon))
    ref = _ref_capsule(images, labels, logits, recon, 0.0005)
    assert jnp.allclose(loss, ref, rtol=1e-5, atol=1e-5), (loss, ref)

    # --- case 2: 'bp*' flag (recon_scale=0.5), bf16 inputs, multi-step grid ---
    B2, C2, H2, W2 = 2, 4, 64, 64
    images2 = jax.random.uniform(k5, (B2, C2, H2, W2),
                                 dtype=jnp.float32).astype(jnp.bfloat16)
    recon2 = jax.random.uniform(k6, (B2, C2 * H2 * W2),
                                dtype=jnp.float32).astype(jnp.bfloat16)
    # small rows_per_tile so the streamed grid has several steps at test size
    loss_bp = jax.block_until_ready(
        capsule_loss(images2, labels, logits, recon2,
                     recon_scale=0.5, rows_per_tile=8))
    ref_bp = _ref_capsule(images2, labels, logits, recon2, 0.5)
    assert jnp.allclose(loss_bp, ref_bp, rtol=2e-4, atol=1e-3), (loss_bp, ref_bp)

    # --- case 3: 'res*' flag -> cross-entropy, reconstruction is None ---
    crit_res = Criterion("res18")
    loss_ce = jax.block_until_ready(crit_res(None, tgt_idx, logits, None))
    ref_ce = _ref_ce(logits, tgt_idx)
    assert jnp.allclose(loss_ce, ref_ce, rtol=1e-5, atol=1e-5), (loss_ce, ref_ce)

    print("KERNEL_OK")
</pallas_src>

<mosaic_0001>
module attributes {stable_mosaic.version = 11 : i64} {
  func.func @kernel(%arg0: i32, %arg1: memref<2x10xf32, #tpu.memory_space<vmem>>, %arg2: memref<2x10xf32, #tpu.memory_space<vmem>>, %arg3: memref<1x1024xf32, #tpu.memory_space<vmem>>, %arg4: memref<1x1024xf32, #tpu.memory_space<vmem>>, %arg5: memref<1x1xf32, #tpu.memory_space<smem>>, %arg6: memref<1xf32, #tpu.memory_space<smem>>) attributes {dimension_semantics = [#tpu.dimension_semantics<arbitrary>], iteration_bounds = array<i64: 1>, scalar_prefetch = 0 : i64, scratch_operands = 1 : i64, tpu.core_type = #tpu.core_type<tc>, window_params = [{pipeline_mode = #tpu.pipeline_mode<synchronous>, transform_indices = @transform_0, window_bounds = array<i64: 2, 10>}, {pipeline_mode = #tpu.pipeline_mode<synchronous>, transform_indices = @transform_1, window_bounds = array<i64: 2, 10>}, {transform_indices = @transform_2, window_bounds = array<i64: 1, 1024>}, {transform_indices = @transform_3, window_bounds = array<i64: 1, 1024>}, {transform_indices = @transform_4, window_bounds = array<i64: 1, 1>}]} {
    %c0_i32 = arith.constant 0 : i32
    %0 = arith.cmpi eq, %arg0, %c0_i32 : i32
    %1 = arith.extui %0 : i1 to i32
    %c0_i32_0 = arith.constant 0 : i32
    %2 = arith.cmpi ne, %1, %c0_i32_0 : i32
    scf.if %2 {
      %cst_8 = arith.constant 0.000000e+00 : f32
      %c0_9 = arith.constant 0 : index
      %17 = memref.load %arg6[%c0_9] : memref<1xf32, #tpu.memory_space<smem>>
      memref.store %cst_8, %arg6[%c0_9] : memref<1xf32, #tpu.memory_space<smem>>
    } else {
    }
    %c0 = arith.constant 0 : index
    %c0_1 = arith.constant 0 : index
    %3 = vector.load %arg4[%c0, %c0_1] : memref<1x1024xf32, #tpu.memory_space<vmem>>, vector<1x1024xf32>
    %c0_2 = arith.constant 0 : index
    %c0_3 = arith.constant 0 : index
    %4 = vector.load %arg3[%c0_2, %c0_3] : memref<1x1024xf32, #tpu.memory_space<vmem>>, vector<1x1024xf32>
    %5 = arith.subf %3, %4 : vector<1x1024xf32>
    %c0_4 = arith.constant 0 : index
    %6 = memref.load %arg6[%c0_4] : memref<1xf32, #tpu.memory_space<smem>>
    %7 = arith.mulf %5, %5 : vector<1x1024xf32>
    %8 = vector.shape_cast %7 : vector<1x1024xf32> to vector<1x1x1024xf32>
    %cst = arith.constant dense<0.000000e+00> : vector<1xf32>
    %9 = vector.multi_reduction <add>, %8, %cst [1, 2] : vector<1x1x1024xf32> to vector<1xf32>
    %10 = vector.shape_cast %9 : vector<1xf32> to vector<1x1x1xf32>
    %11 = vector.extract %10[0, 0, 0] : f32 from vector<1x1x1xf32>
    %12 = arith.addf %6, %11 : f32
    %c0_5 = arith.constant 0 : index
    %13 = memref.load %arg6[%c0_5] : memref<1xf32, #tpu.memory_space<smem>>
    memref.store %12, %arg6[%c0_5] : memref<1xf32, #tpu.memory_space<smem>>
    %c0_i32_6 = arith.constant 0 : i32
    %14 = arith.cmpi eq, %arg0, %c0_i32_6 : i32
    %15 = arith.extui %14 : i1 to i32
    %c0_i32_7 = arith.constant 0 : i32
    %16 = arith.cmpi ne, %15, %c0_i32_7 : i32
    scf.if %16 {
      %c0_8 = arith.constant 0 : index
      %c0_9 = arith.constant 0 : index
      %17 = vector.load %arg2[%c0_8, %c0_9] : memref<2x10xf32, #tpu.memory_space<vmem>>, vector<2x10xf32>
      %c0_10 = arith.constant 0 : index
      %c0_11 = arith.constant 0 : index
      %18 = vector.load %arg1[%c0_10, %c0_11] : memref<2x10xf32, #tpu.memory_space<vmem>>, vector<2x10xf32>
      %cst_12 = arith.constant 0.899999976 : f32
      %19 = vector.broadcast %cst_12 : f32 to vector<2x10xf32>
      %20 = arith.subf %19, %17 : vector<2x10xf32>
      %cst_13 = arith.constant 0.000000e+00 : f32
      %21 = vector.broadcast %cst_13 : f32 to vector<2x10xf32>
      %22 = arith.maximumf %20, %21 : vector<2x10xf32>
      %23 = arith.mulf %22, %22 : vector<2x10xf32>
      %cst_14 = arith.constant 1.000000e-01 : f32
      %24 = vector.broadcast %cst_14 : f32 to vector<2x10xf32>
      %25 = arith.subf %17, %24 : vector<2x10xf32>
      %cst_15 = arith.constant 0.000000e+00 : f32
      %26 = vector.broadcast %cst_15 : f32 to vector<2x10xf32>
      %27 = arith.maximumf %25, %26 : vector<2x10xf32>
      %28 = arith.mulf %27, %27 : vector<2x10xf32>
      %29 = arith.mulf %18, %23 : vector<2x10xf32>
      %30 = vector.shape_cast %29 : vector<2x10xf32> to vector<1x2x10xf32>
      %cst_16 = arith.constant dense<0.000000e+00> : vector<1xf32>
      %31 = vector.multi_reduction <add>, %30, %cst_16 [1, 2] : vector<1x2x10xf32> to vector<1xf32>
      %32 = vector.shape_cast %31 : vector<1xf32> to vector<1x1x1xf32>
      %33 = vector.extract %32[0, 0, 0] : f32 from vector<1x1x1xf32>
      %cst_17 = arith.constant 1.000000e+00 : f32
      %34 = vector.broadcast %cst_17 : f32 to vector<2x10xf32>
      %35 = arith.subf %34, %18 : vector<2x10xf32>
      %36 = arith.mulf %35, %28 : vector<2x10xf32>
      %37 = vector.shape_cast %36 : vector<2x10xf32> to vector<1x2x10xf32>
      %cst_18 = arith.constant dense<0.000000e+00> : vector<1xf32>
      %38 = vector.multi_reduction <add>, %37, %cst_18 [1, 2] : vector<1x2x10xf32> to vector<1xf32>
      %39 = vector.shape_cast %38 : vector<1xf32> to vector<1x1x1xf32>
      %40 = vector.extract %39[0, 0, 0] : f32 from vector<1x1x1xf32>
      %cst_19 = arith.constant 5.000000e-01 : f32
      %41 = arith.mulf %cst_19, %40 : f32
      %42 = arith.addf %33, %41 : f32
      %c0_20 = arith.constant 0 : index
      %43 = memref.load %arg6[%c0_20] : memref<1xf32, #tpu.memory_space<smem>>
      %cst_21 = arith.constant 5.000000e-04 : f32
      %44 = arith.mulf %cst_21, %43 : f32
      %45 = arith.addf %42, %44 : f32
      %c0_22 = arith.constant 0 : index
      %c0_23 = arith.constant 0 : index
      %46 = memref.load %arg5[%c0_22, %c0_23] : memref<1x1xf32, #tpu.memory_space<smem>>
      memref.store %45, %arg5[%c0_22, %c0_23] : memref<1x1xf32, #tpu.memory_space<smem>>
    } else {
    }
    return
  }
  func.func @transform_0(%arg0: i32) -> (i32, i32) {
    %c0_i32 = arith.constant 0 : i32
    %c0_i32_0 = arith.constant 0 : i32
    %c0_i32_1 = arith.constant 0 : i32
    return %c0_i32, %c0_i32_0 : i32, i32
  }
  func.func @transform_1(%arg0: i32) -> (i32, i32) {
    %c0_i32 = arith.constant 0 : i32
    %c0_i32_0 = arith.constant 0 : i32
    %c0_i32_1 = arith.constant 0 : i32
    return %c0_i32, %c0_i32_0 : i32, i32
  }
  func.func @transform_2(%arg0: i32) -> (i32, i32) {
    %c0_i32 = arith.constant 0 : i32
    %c0_i32_0 = arith.constant 0 : i32
    return %arg0, %c0_i32 : i32, i32
  }
  func.func @transform_3(%arg0: i32) -> (i32, i32) {
    %c0_i32 = arith.constant 0 : i32
    %c0_i32_0 = arith.constant 0 : i32
    return %arg0, %c0_i32 : i32, i32
  }
  func.func @transform_4(%arg0: i32) -> (i32, i32) {
    %c0_i32 = arith.constant 0 : i32
    %c0_i32_0 = arith.constant 0 : i32
    %c0_i32_1 = arith.constant 0 : i32
    return %c0_i32, %c0_i32_0 : i32, i32
  }
}

</mosaic_0001>

<bundles_post_ra>
// kernel: tpu_custom_call.1
= control target key start
LH: loop header
LB: loop body
LE: loop exit
PB: predicated region body
PF: predicated region fallthrough
CT: control target
= control target key end

     0   :  { %9 = vsyncpa [#allocation4], 0  ;;  %s329_s0 = inlined_call_operand.hbm [shape: f32[2,10], index: 0, kind: input, shape index: {}]   ;;  %s330_s1 = inlined_call_operand.vmem [shape: f32[2,10], index: 1, kind: input, shape index: {}]   ;;  %s331_s2 = inlined_call_operand.hbm [shape: f32[1,1024], index: 2, kind: input, shape index: {}]   ;;  %s332_s3 = inlined_call_operand.vmem [shape: f32[1,1024], index: 3, kind: input, shape index: {}]   ;;  %s333_s4 = inlined_call_operand.hbm [shape: f32[1,1], index: 4, kind: output, shape index: {}]  }
   0x1   :  { %10 = vsyncpa [#allocation7], 0 }
   0x2   :  { %11 = vsyncpa [#allocation5], 0  ;;  %s249_s15 = smov [#allocation3]   ;;  %s250_s17 = smov [#allocation6]  }
   0x3   :  { %s18_s16 = sshll.u32 %s249_s15, 4  ;;  %s30_s18 = sshll.u32 %s250_s17, 4  ;;  %s19_s16 = int_to_ptr.vmem [resolvable:$true] %s18_s16  ;;  %s31_s18 = int_to_ptr.vmem [resolvable:$true] %s30_s18 }
   0x4   :  { %s189_s21 = scalar_lea.hbm %s329_s0, 32 }
   0x5   :  { %p190_p0 = scmp.ne.s32.totalorder %s329_s0, %s189_s21  ;;  %p193_p1 = scmp.lt.u32.totalorder %s189_s21, %s329_s0 }
   0x7   :  { %p195_p2 = pnand %p193_p1, %p190_p0 }
   0x9   :  { %198 = shalt.err (!%p195_p2)
}
   0xa   :  { %s199_s26 = scalar_lea.vmem %s19_s16, 32  ;;  %p204_p4 = scmp.lt.s32.totalorder %s19_s16, %s19_s16 }
   0xb   :  { %p200_p3 = scmp.ne.s32.totalorder %s19_s16, %s199_s26  ;;  %p205_p5 = scmp.lt.s32.totalorder %s199_s26, %s199_s26 }
   0xd   :  { %p206_p6 = por %p205_p5, %p204_p4 }
   0xf   :  { %p207_p7 = pnand %p206_p6, %p200_p3 }
  0x11   :  { %210 = shalt.err (!%p207_p7)
}
  0x12   :  { %21 = dma.hbm_to_vmem [thread:$0]  %s329_s0, 32, %s19_s16, [#allocation4]  }
  0x13   :  { %s211_s5 = scalar_lea.hbm %s331_s2, 128 }
  0x14   :  { %p212_p8 = scmp.ne.s32.totalorder %s331_s2, %s211_s5  ;;  %p215_p9 = scmp.lt.u32.totalorder %s211_s5, %s331_s2 }
  0x16   :  { %p217_p10 = pnand %p215_p9, %p212_p8 }
  0x18   :  { %220 = shalt.err (!%p217_p10)
}
  0x19   :  { %s221_s10 = scalar_lea.vmem %s31_s18, 128  ;;  %p226_p12 = scmp.lt.s32.totalorder %s31_s18, %s31_s18 }
  0x1a   :  { %p222_p11 = scmp.ne.s32.totalorder %s31_s18, %s221_s10  ;;  %p227_p13 = scmp.lt.s32.totalorder %s221_s10, %s221_s10 }
  0x1c   :  { %p228_p0 = por %p227_p13, %p226_p12 }
  0x1e   :  { %p229_p1 = pnand %p228_p0, %p222_p11 }
  0x20   :  { %232 = shalt.err (!%p229_p1)
}
  0x21   :  { %33 = dma.hbm_to_vmem [thread:$0]  %s331_s2, 128, %s31_s18, [#allocation7]  }
  0x22   :  { %243 = dma.done.wait [#allocation4], 32  }
  0x23   :  { %244 = vsyncadd [#allocation4], 4294967264 }
  0x24   :  { %245 = dma.done.wait [#allocation7], 128  }
  0x25   :  { %246 = vsyncadd [#allocation7], 4294967168  ;;  %v54_v0 = vlaneseq  ;;  %v125_v2 = vld [vmem:[%s330_s1] sm:$0x3]  ;;  %v126_v3 = vld [vmem:[#allocation3] sm:$0x3] }
  0x26   :  { %v48_v4 = vld [vmem:[%s332_s3] sm:$0xff]  ;;  %v179_v5 = vadd.f32 -0.1, %v125_v2  ;;  %v49_v6 = vld [vmem:[#allocation6] sm:$0xff]  ;;  %v145_v13 = vsub.f32 1.0, %v126_v3  ;;  %vm134_vm0 = vcmask 74752  }
  0x27   :  { %v55_v1 = vshrl.u32 %v54_v0, 7  ;;  %v50_v8 = vsub.f32 %v48_v4, %v49_v6  ;;  %vm94_vm1 = vcmask 1040384   ;;  %v127_v24 = vsub.f32 0.9, %v125_v2  ;;  %s233_s22 = scalar_lea.hbm %s333_s4, 16 }
  0x28   :  { %v131_v12 = vmax.f32 %v179_v5, 0.0  ;;  %p234_p2 = scmp.ne.s32.totalorder %s333_s4, %s233_s22  ;;  %p237_p3 = scmp.lt.u32.totalorder %s233_s22, %s333_s4 }
  0x29   :  { %v56_v7 = vsub.s32 0, %v55_v1  ;;  %v60_v9 = vsub.s32 1, %v55_v1  ;;  %v64_v10 = vsub.s32 2, %v55_v1  ;;  %v68_v11 = vsub.s32 3, %v55_v1 }
  0x2a   :  { %v52_v14 = vmul.f32 %v50_v8, %v50_v8  ;;  %v72_v15 = vsub.s32 4, %v55_v1  ;;  %v132_v16 = vmul.f32 %v131_v12, %v131_v12  ;;  %v76_v17 = vsub.s32 5, %v55_v1  ;;  %p239_p4 = pnand %p237_p3, %p234_p2 }
  0x2b   :  { %v80_v23 = vsub.s32 6, %v55_v1  ;;  %v84_v32 = vsub.s32 7, %v55_v1  ;;  %v128_v37 = vmax.f32 %v127_v24, 0.0 }
  0x2c   :  { %v57_v18 = vrot.slane %v52_v14, %v56_v7  ;;  %v61_v19 = vrot.slane %v52_v14, %v60_v9  ;;  %v65_v20 = vrot.slane %v52_v14, %v64_v10  ;;  %v69_v21 = vrot.slane %v52_v14, %v68_v11 }
  0x2d   :  { %v146_v22 = vmul.f32 %v145_v13, %v132_v16  ;;  %v73_v25 = vrot.slane %v52_v14, %v72_v15  ;;  %v77_v31 = vrot.slane %v52_v14, %v76_v17  ;;  %v81_v35 = vrot.slane %v52_v14, %v80_v23 }
  0x2e   :  { %v95_v26 = vsel %vm94_vm1, %v57_v18, 0.0  ;;  %v96_v27 = vsel %vm94_vm1, %v61_v19, 0.0  ;;  %v98_v28 = vsel %vm94_vm1, %v65_v20, 0.0  ;;  %v100_v33 = vsel %vm94_vm1, %v69_v21, 0.0 }
  0x2f   :  { %v147_v29 = vsel %vm134_vm0, %v146_v22, 0.0  ;;  %v97_v30 = vadd.f32 %v96_v27, %v95_v26  ;;  %v102_v36 = vsel %vm94_vm1, %v73_v25, 0.0  ;;  %v85_v39 = vrot.slane %v52_v14, %v84_v32 }
  0x30   :  { %148 = vadd.xlane.f32.xlu1 %v147_v29  ;;  %v104_v40 = vsel %vm94_vm1, %v77_v31, 0.0  ;;  %v106_v42 = vsel %vm94_vm1, %v81_v35, 0.0  ;;  %v129_v43 = vmul.f32 %v128_v37, %v128_v37 }
  0x31   :  { %v99_v34 = vadd.f32 %v98_v28, %v97_v30  ;;  %v108_v45 = vsel %vm94_vm1, %v85_v39, 0.0 }
  0x32   :  { %v133_v47 = vmul.f32 %v129_v43, %v126_v3 }
  0x33   :  { %v101_v38 = vadd.f32 %v100_v33, %v99_v34 }
  0x34   :  { %v135_v49 = vsel %vm134_vm0, %v133_v47, 0.0 }
  0x35   :  { %v103_v41 = vadd.f32 %v102_v36, %v101_v38 }
  0x37   :  { %v105_v44 = vadd.f32 %v104_v40, %v103_v41 }
  0x39   :  { %v107_v46 = vadd.f32 %v106_v42, %v105_v44 }
  0x3b   :  { %v109_v48 = vadd.f32 %v108_v45, %v107_v46 }
  0x3d   :  { %110 = vadd.xlane.f32.xlu0 %v109_v48 }
  0x41   :  { %136 = vadd.xlane.f32.xlu0 %v135_v49 }
  0xbd   :  { %v149_v50 = vpop.xlane.xlu1 %148 }
  0xbe   :  { %v150_v51 = vrot.slane %v149_v50, 4 }
  0xc0   :  { %v151_v52 = vadd.f32 %v150_v51, %v149_v50 }
  0xc2   :  { %v152_v56 = vrot.slane %v151_v52, 2 }
  0xc4   :  { %v153_v62 = vadd.f32 %v152_v56, %v151_v52 }
  0xc6   :  { %v154_v3 = vrot.slane %v153_v62, 1 }
  0xc8   :  { %v155_v6 = vadd.f32 %v154_v3, %v153_v62 }
  0xca   :  { %v111_v53 = vpop.xlane.xlu0 %110 }
  0xcb   :  { %v112_v54 = vrot.slane %v111_v53, 4 }
  0xcd   :  { %v113_v55 = vadd.f32 %v112_v54, %v111_v53 }
  0xce   :  { %v137_v57 = vpop.xlane.xlu0 %136 }
  0xcf   :  { %v114_v58 = vrot.slane %v113_v55, 2  ;;  %v138_v59 = vrot.slane %v137_v57, 4 }
  0xd1   :  { %v139_v60 = vadd.f32 %v138_v59, %v137_v57  ;;  %v115_v61 = vadd.f32 %v114_v58, %v113_v55 }
  0xd3   :  { %v140_v63 = vrot.slane %v139_v60, 2  ;;  %v116_v0 = vrot.slane %v115_v61, 1 }
  0xd5   :  { %v141_v1 = vadd.f32 %v140_v63, %v139_v60  ;;  %v117_v2 = vadd.f32 %v116_v0, %v115_v61 }
  0xd7   :  { %180 = vpush %v117_v2  ;;  %v142_v4 = vrot.slane %v141_v1, 1 }
  0xd9   :  { %v143_v5 = vadd.f32 %v142_v4, %v141_v1 }
  0xdb   :  { %182 = vpush %v143_v5 }
  0xdc   :  { %184 = vpush %v155_v6 }
 0x108   :  { %s181_s1 = spop %180 }
 0x109   :  { %s160_s17 = smul.f32 0.0005, %s181_s1 }
 0x10c   :  { %s183_s2 = spop %182 }
 0x10d   :  { %s185_s3 = spop %184 }
 0x10e   :  { %s157_s16 = smul.f32 0.5, %s185_s3 }
 0x110   :  { %s158_s18 = sadd.f32 %s183_s2, %s157_s16 }
 0x112   :  { %s161_s19 = sadd.f32 %s160_s17, %s158_s18 }
 0x114   :  { %163 = sst [smem:[#allocation8]] %s161_s19 }
 0x115   :  { %242 = shalt.err (!%p239_p4)
}
 0x116   :  { %s251_s27 = smov [#allocation8]  }
 0x117   :  { %171 = dma.smem_to_hbm %s251_s27, 16, %s333_s4, [#allocation5]  }
 0x118   :  { %247 = dma.done.wait [#allocation5], 16  }
 0x119   :  { %248 = vsyncadd [#allocation5], 4294967280 }
 0x11a   :  { %175 = sfence }
 0x11b   :  { %176 = vsyncpa [#allocation4], 1 }
 0x11c   :  { %177 = vsyncpa [#allocation7], 1 }
 0x11d   :  { %178 = vsyncpa [#allocation5], 1 }

</bundles_post_ra>
